<compile_context>
chip_gen: v6e
topology: v6e:2x2x1
jax: 0.10.0
libtpu: 0.0.40
codegen_flags: <defaults>
</compile_context>

<pallas_src>
import jax
import jax.numpy as jnp
from jax.experimental import pallas as pl
from jax.experimental.pallas import tpu as pltpu


def _round_up(x: int, m: int) -> int:
    return ((x + m - 1) // m) * m


def _vmem_capacity_bytes() -> int:
    """VMEM capacity with a device-kind-aware fallback (128 MiB on v5e/v6e)."""
    try:
        cap = int(getattr(pltpu.get_tpu_info(), "vmem_capacity_bytes", 0))
        if cap > 0:
            return cap
    except Exception:
        pass
    try:
        kind = jax.devices()[0].device_kind.lower()
    except Exception:
        kind = ""
    if "v7" in kind or "7x" in kind:
        return 64 * 1024 * 1024
    return 128 * 1024 * 1024  # v4 / v5e / v5p / v6e


def _choose_geometry(K1p: int, Hp: int, V: int, vmem: int):
    """Footprint-driven tile sizes: (TV, Vp, bb_cap, vmem_limit_bytes)."""
    budget = max(32 * 1024 * 1024, min(int(vmem * 0.7), 100 * 1024 * 1024))
    Vp0 = _round_up(V, 128)

    # Batch-block cap: 256 on 128-MiB parts (wide MXU M), footprint-limited on
    # 64-MiB v7x so the resident full-vocab f32 output row stays affordable.
    bb_cap = 256 if vmem >= 100 * 1024 * 1024 else 128
    while bb_cap > 16 and 2 * bb_cap * Vp0 * 4 > budget // 2:
        bb_cap //= 2
    bb_cap = max(16, bb_cap)

    def footprint(tv: int) -> int:
        vp = _round_up(Vp0, tv)
        return (2 * bb_cap * K1p * 2      # x block (bf16, double-buffered)
                + 2 * K1p * Hp * 2        # W1 (resident, counted x2)
                + 2 * Hp * 4              # b1
                + 2 * Hp * tv * 2         # W2 stream (double-buffered)
                + 2 * tv * 4              # b2 stream
                + 2 * bb_cap * vp * 4     # probs output row (f32)
                + bb_cap * Hp * 2)        # h scratch (bf16)

    tv = 128
    for cand in (2048, 1024, 512, 256, 128):
        c = max(128, min(cand, Vp0))
        if footprint(c) <= budget:
            tv = c
            break
    Vp = _round_up(Vp0, tv)
    return tv, Vp, bb_cap, budget


def _fused_kernel(x_ref, w1_ref, b1_ref, w2_ref, b2_ref, probs_ref, h_ref):
    # x_ref:  (BB, K1p) bf16   w1_ref: (K1p, Hp) bf16   b1_ref: (1, Hp) f32
    # w2_ref: (Hp, TV)  bf16   b2_ref: (1, TV)   f32
    # probs_ref: (BB, Vp) f32  -- resident across the vocab axis, written to
    #                             HBM once per batch block.
    # h_ref:  (BB, Hp) bf16 VMEM scratch (persists across vocab tiles).
    v = pl.program_id(1)
    nv = pl.num_programs(1)
    tv = w2_ref.shape[1]
    vp = probs_ref.shape[1]

    @pl.when(v == 0)
    def _():
        h = jnp.dot(x_ref[...], w1_ref[...], preferred_element_type=jnp.float32)
        h = jnp.maximum(h + b1_ref[...], 0.0)       # bias + ReLU in f32
        h_ref[...] = h.astype(h_ref.dtype)          # cache as bf16 for the MXU

    logits = jnp.dot(h_ref[...], w2_ref[...], preferred_element_type=jnp.float32)
    logits = logits + b2_ref[...]                   # padded vocab cols get -1e30
    if vp == tv:
        probs_ref[...] = logits
    else:
        off = pl.multiple_of(v * tv, tv)
        probs_ref[:, pl.ds(off, tv)] = logits

    @pl.when(v == nv - 1)
    def _():
        row = probs_ref[...]
        m = jnp.max(row, axis=-1, keepdims=True)
        e = jnp.exp(row - m)                        # padded cols underflow to 0
        denom = jnp.sum(e, axis=-1, keepdims=True)
        probs_ref[...] = e / denom                  # exact divide (mem-bound)


def make_next_token_forward(emb, w1, b1, w2, b2):
    """Pad/cast parameters once; return forward(token_ids) -> probs (B, V)."""
    V, H = emb.shape
    K1 = w1.shape[0]
    assert w1.shape == (K1, H) and b1.shape == (H,)
    assert w2.shape == (H, V) and b2.shape == (V,)

    f32, bf16 = jnp.float32, jnp.bfloat16
    Hp = _round_up(H, 128)
    K1p = _round_up(K1, 128)
    vmem = _vmem_capacity_bytes()
    TV, Vp, bb_cap, vmem_limit = _choose_geometry(K1p, Hp, V, vmem)

    def pad2(a, rows, cols, dtype, fill=0.0):
        out = jnp.full((rows, cols), fill, dtype)
        return out.at[: a.shape[0], : a.shape[1]].set(a.astype(dtype))

    # One-time weight padding / casting (kept out of the per-call hot path).
    emb_bf = emb.astype(bf16)
    w1_p = pad2(w1, K1p, Hp, bf16)
    b1_p = pad2(b1.reshape(1, H), 1, Hp, f32)
    w2_p = pad2(w2, Hp, Vp, bf16)
    b2_p = pad2(b2.reshape(1, V), 1, Vp, f32, fill=-1e30)   # kill padded cols

    def forward(token_ids):
        B, T = token_ids.shape
        assert T * H == K1, f"only support context length of {K1 // H}"

        # Embedding gather + flatten (XLA glue); gather runs in bf16.
        x = jnp.take(emb_bf, token_ids, axis=0).reshape(B, K1)

        # Divisor-aware batch blocking, aligned to the bf16 (16,128) tile.
        Bp0 = _round_up(B, 16)
        nb = -(-Bp0 // bb_cap)
        BB = _round_up(-(-Bp0 // nb), 16)
        Bp = nb * BB
        nv = Vp // TV

        x_p = jnp.zeros((Bp, K1p), bf16).at[:B, :K1].set(x)

        probs_p = pl.pallas_call(
            _fused_kernel,
            out_shape=jax.ShapeDtypeStruct((Bp, Vp), f32),
            grid_spec=pltpu.PrefetchScalarGridSpec(
                num_scalar_prefetch=0,
                grid=(nb, nv),
                in_specs=[
                    pl.BlockSpec((BB, K1p), lambda b, v: (b, 0)),  # x (per b)
                    pl.BlockSpec((K1p, Hp), lambda b, v: (0, 0)),  # W1 resident
                    pl.BlockSpec((1, Hp), lambda b, v: (0, 0)),    # b1 resident
                    pl.BlockSpec((Hp, TV), lambda b, v: (0, v)),   # W2 streamed
                    pl.BlockSpec((1, TV), lambda b, v: (0, v)),    # b2 streamed
                ],
                out_specs=pl.BlockSpec((BB, Vp), lambda b, v: (b, 0)),
                scratch_shapes=[pltpu.VMEM((BB, Hp), bf16)],
            ),
            compiler_params=pltpu.CompilerParams(
                dimension_semantics=("parallel", "arbitrary"),
                vmem_limit_bytes=int(vmem_limit),
            ),
        )(x_p, w1_p, b1_p, w2_p, b2_p)

        return probs_p[:B, :V]

    return forward


if __name__ == "__main__":
    vocab_size = 32
    context_length = 8
    hidden_dim = 32
    batch = 2

    key = jax.random.PRNGKey(0)
    k_tok, k_emb, k_w1, k_b1, k_w2, k_b2 = jax.random.split(key, 6)

    token_ids = jax.random.randint(
        k_tok, (batch, context_length), 0, vocab_size, dtype=jnp.int32
    )
    emb = jax.random.normal(k_emb, (vocab_size, hidden_dim), jnp.float32) * 0.02
    w1 = jax.random.normal(
        k_w1, (context_length * hidden_dim, hidden_dim), jnp.float32
    ) * 0.02
    b1 = jax.random.normal(k_b1, (hidden_dim,), jnp.float32) * 0.02
    w2 = jax.random.normal(k_w2, (hidden_dim, vocab_size), jnp.float32) * 0.02
    b2 = jax.random.normal(k_b2, (vocab_size,), jnp.float32) * 0.02

    forward = make_next_token_forward(emb, w1, b1, w2, b2)
    probs = jax.block_until_ready(forward(token_ids))

    # Pure-JAX reference using the same bf16 rounding the kernel applies
    # (weights/activations bf16, accumulation + bias + softmax in f32).
    def bf(a):
        return a.astype(jnp.bfloat16).astype(jnp.float32)

    x_ref = jnp.take(emb, token_ids, axis=0).reshape(batch, -1)
    h_ref = jnp.maximum(bf(x_ref) @ bf(w1) + b1, 0.0)
    logits_ref = bf(h_ref) @ bf(w2) + b2
    ref = jax.nn.softmax(logits_ref, axis=-1)

    assert probs.shape == (batch, vocab_size)
    assert bool(jnp.all(jnp.isfinite(probs)))
    assert jnp.allclose(jnp.sum(probs, axis=-1), 1.0, atol=1e-3)
    assert jnp.allclose(probs, ref, atol=1e-3, rtol=1e-3)

    print("KERNEL_OK")
</pallas_src>

<mosaic_0001>
module attributes {stable_mosaic.version = 11 : i64} {
  func.func @_fused_kernel(%arg0: i32, %arg1: i32, %arg2: memref<16x256xbf16, #tpu.memory_space<vmem>>, %arg3: memref<256x128xbf16, #tpu.memory_space<vmem>>, %arg4: memref<1x128xf32, #tpu.memory_space<vmem>>, %arg5: memref<128x128xbf16, #tpu.memory_space<vmem>>, %arg6: memref<1x128xf32, #tpu.memory_space<vmem>>, %arg7: memref<16x128xf32, #tpu.memory_space<vmem>>, %arg8: memref<16x128xbf16, #tpu.memory_space<vmem>>) attributes {dimension_semantics = [#tpu.dimension_semantics<parallel>, #tpu.dimension_semantics<arbitrary>], iteration_bounds = array<i64: 1, 1>, scalar_prefetch = 0 : i64, scratch_operands = 1 : i64, tpu.core_type = #tpu.core_type<tc>, window_params = [{transform_indices = @transform_0, window_bounds = array<i64: 16, 256>}, {pipeline_mode = #tpu.pipeline_mode<synchronous>, transform_indices = @transform_1, window_bounds = array<i64: 256, 128>}, {pipeline_mode = #tpu.pipeline_mode<synchronous>, transform_indices = @transform_2, window_bounds = array<i64: 1, 128>}, {transform_indices = @transform_3, window_bounds = array<i64: 128, 128>}, {transform_indices = @transform_4, window_bounds = array<i64: 1, 128>}, {transform_indices = @transform_5, window_bounds = array<i64: 16, 128>}]} {
    %c0_i32 = arith.constant 0 : i32
    %0 = arith.cmpi eq, %arg1, %c0_i32 : i32
    %1 = arith.extui %0 : i1 to i32
    %c0_i32_0 = arith.constant 0 : i32
    %2 = arith.cmpi ne, %1, %c0_i32_0 : i32
    scf.if %2 {
      %c0_10 = arith.constant 0 : index
      %c0_11 = arith.constant 0 : index
      %13 = vector.load %arg2[%c0_10, %c0_11] : memref<16x256xbf16, #tpu.memory_space<vmem>>, vector<16x256xbf16>
      %c0_12 = arith.constant 0 : index
      %c0_13 = arith.constant 0 : index
      %14 = vector.load %arg3[%c0_12, %c0_13] : memref<256x128xbf16, #tpu.memory_space<vmem>>, vector<256x128xbf16>
      %cst_14 = arith.constant dense<0.000000e+00> : vector<16x128xf32>
      %15 = tpu.matmul %13, %14, %cst_14 {dimension_numbers = #tpu.dot_dimension_numbers<[1], [0], [0], [1], [0, 0, 1, 1], [], []>} : vector<16x256xbf16>, vector<256x128xbf16>, vector<16x128xf32> -> vector<16x128xf32>
      %c0_15 = arith.constant 0 : index
      %c0_16 = arith.constant 0 : index
      %16 = vector.load %arg4[%c0_15, %c0_16] : memref<1x128xf32, #tpu.memory_space<vmem>>, vector<1x128xf32>
      %17 = vector.broadcast %16 : vector<1x128xf32> to vector<16x128xf32>
      %18 = arith.addf %15, %17 : vector<16x128xf32>
      %cst_17 = arith.constant 0.000000e+00 : f32
      %19 = vector.broadcast %cst_17 : f32 to vector<16x128xf32>
      %20 = arith.maximumf %18, %19 : vector<16x128xf32>
      %21 = arith.truncf %20 : vector<16x128xf32> to vector<16x128xbf16>
      %c0_18 = arith.constant 0 : index
      %c0_19 = arith.constant 0 : index
      %22 = vector.load %arg8[%c0_18, %c0_19] : memref<16x128xbf16, #tpu.memory_space<vmem>>, vector<16x128xbf16>
      tpu.vector_store %arg8[%c0_18, %c0_19], %21 {strides = array<i32>} : memref<16x128xbf16, #tpu.memory_space<vmem>>, vector<16x128xbf16>,
    } else {
    }
    %c0 = arith.constant 0 : index
    %c0_1 = arith.constant 0 : index
    %3 = vector.load %arg8[%c0, %c0_1] : memref<16x128xbf16, #tpu.memory_space<vmem>>, vector<16x128xbf16>
    %c0_2 = arith.constant 0 : index
    %c0_3 = arith.constant 0 : index
    %4 = vector.load %arg5[%c0_2, %c0_3] : memref<128x128xbf16, #tpu.memory_space<vmem>>, vector<128x128xbf16>
    %cst = arith.constant dense<0.000000e+00> : vector<16x128xf32>
    %5 = tpu.matmul %3, %4, %cst {dimension_numbers = #tpu.dot_dimension_numbers<[1], [0], [0], [1], [0, 0, 1, 1], [], []>} : vector<16x128xbf16>, vector<128x128xbf16>, vector<16x128xf32> -> vector<16x128xf32>
    %c0_4 = arith.constant 0 : index
    %c0_5 = arith.constant 0 : index
    %6 = vector.load %arg6[%c0_4, %c0_5] : memref<1x128xf32, #tpu.memory_space<vmem>>, vector<1x128xf32>
    %7 = vector.broadcast %6 : vector<1x128xf32> to vector<16x128xf32>
    %8 = arith.addf %5, %7 : vector<16x128xf32>
    %c0_6 = arith.constant 0 : index
    %c0_7 = arith.constant 0 : index
    %9 = vector.load %arg7[%c0_6, %c0_7] : memref<16x128xf32, #tpu.memory_space<vmem>>, vector<16x128xf32>
    tpu.vector_store %arg7[%c0_6, %c0_7], %8 {strides = array<i32>} : memref<16x128xf32, #tpu.memory_space<vmem>>, vector<16x128xf32>,
    %c0_i32_8 = arith.constant 0 : i32
    %10 = arith.cmpi eq, %arg1, %c0_i32_8 : i32
    %11 = arith.extui %10 : i1 to i32
    %c0_i32_9 = arith.constant 0 : i32
    %12 = arith.cmpi ne, %11, %c0_i32_9 : i32
    scf.if %12 {
      %c0_10 = arith.constant 0 : index
      %c0_11 = arith.constant 0 : index
      %13 = vector.load %arg7[%c0_10, %c0_11] : memref<16x128xf32, #tpu.memory_space<vmem>>, vector<16x128xf32>
      %cst_12 = arith.constant dense<0xFF800000> : vector<16xf32>
      %14 = vector.multi_reduction <maximumf>, %13, %cst_12 [1] : vector<16x128xf32> to vector<16xf32>
      %15 = vector.shape_cast %14 : vector<16xf32> to vector<16x1xf32>
      %16 = vector.broadcast %15 : vector<16x1xf32> to vector<16x128xf32>
      %17 = arith.subf %13, %16 : vector<16x128xf32>
      %18 = math.exp %17 : vector<16x128xf32>
      %cst_13 = arith.constant dense<0.000000e+00> : vector<16xf32>
      %19 = vector.multi_reduction <add>, %18, %cst_13 [1] : vector<16x128xf32> to vector<16xf32>
      %20 = vector.shape_cast %19 : vector<16xf32> to vector<16x1xf32>
      %21 = vector.broadcast %20 : vector<16x1xf32> to vector<16x128xf32>
      %22 = arith.divf %18, %21 : vector<16x128xf32>
      %c0_14 = arith.constant 0 : index
      %c0_15 = arith.constant 0 : index
      %23 = vector.load %arg7[%c0_14, %c0_15] : memref<16x128xf32, #tpu.memory_space<vmem>>, vector<16x128xf32>
      tpu.vector_store %arg7[%c0_14, %c0_15], %22 {strides = array<i32>} : memref<16x128xf32, #tpu.memory_space<vmem>>, vector<16x128xf32>,
    } else {
    }
    return
  }
  func.func @transform_0(%arg0: i32, %arg1: i32) -> (i32, i32) {
    %c0_i32 = arith.constant 0 : i32
    %c0_i32_0 = arith.constant 0 : i32
    return %arg0, %c0_i32 : i32, i32
  }
  func.func @transform_1(%arg0: i32, %arg1: i32) -> (i32, i32) {
    %c0_i32 = arith.constant 0 : i32
    %c0_i32_0 = arith.constant 0 : i32
    %c0_i32_1 = arith.constant 0 : i32
    return %c0_i32, %c0_i32_0 : i32, i32
  }
  func.func @transform_2(%arg0: i32, %arg1: i32) -> (i32, i32) {
    %c0_i32 = arith.constant 0 : i32
    %c0_i32_0 = arith.constant 0 : i32
    %c0_i32_1 = arith.constant 0 : i32
    return %c0_i32, %c0_i32_0 : i32, i32
  }
  func.func @transform_3(%arg0: i32, %arg1: i32) -> (i32, i32) {
    %c0_i32 = arith.constant 0 : i32
    %c0_i32_0 = arith.constant 0 : i32
    return %c0_i32, %arg1 : i32, i32
  }
  func.func @transform_4(%arg0: i32, %arg1: i32) -> (i32, i32) {
    %c0_i32 = arith.constant 0 : i32
    %c0_i32_0 = arith.constant 0 : i32
    return %c0_i32, %arg1 : i32, i32
  }
  func.func @transform_5(%arg0: i32, %arg1: i32) -> (i32, i32) {
    %c0_i32 = arith.constant 0 : i32
    %c0_i32_0 = arith.constant 0 : i32
    return %arg0, %c0_i32 : i32, i32
  }
}

</mosaic_0001>

<bundles_post_ra>
// kernel: tpu_custom_call.1
= control target key start
LH: loop header
LB: loop body
LE: loop exit
PB: predicated region body
PF: predicated region fallthrough
CT: control target
= control target key end

     0   :  { %10 = vsyncpa [#allocation4], 0  ;;  %s717_s0 = inlined_call_operand.hbm [shape: bf16[16,256], index: 0, kind: input, shape index: {}]   ;;  %s718_s1 = inlined_call_operand.hbm [shape: bf16[256,128], index: 1, kind: input, shape index: {}]   ;;  %s719_s2 = inlined_call_operand.vmem [shape: f32[1,128], index: 2, kind: input, shape index: {}]   ;;  %s720_s3 = inlined_call_operand.hbm [shape: bf16[128,128], index: 3, kind: input, shape index: {}]   ;;  %s721_s4 = inlined_call_operand.vmem [shape: f32[1,128], index: 4, kind: input, shape index: {}]   ;;  %s722_s5 = inlined_call_operand.hbm [shape: f32[16,128], index: 5, kind: output, shape index: {}]  }
   0x1   :  { %11 = vsyncpa [#allocation7], 0 }
   0x2   :  { %12 = vsyncpa [#allocation5], 0  ;;  %s653_s18 = smov [#allocation6]  }
   0x3   :  { %s30_s19 = sshll.u32 %s653_s18, 4  ;;  %s31_s19 = int_to_ptr.vmem [resolvable:$true] %s30_s19 }
   0x4   :  { %s575_s20 = scalar_lea.vmem %s31_s19, 2048  ;;  %p580_p1 = scmp.lt.s32.totalorder %s31_s19, %s31_s19 }
   0x5   :  { %p576_p0 = scmp.ne.s32.totalorder %s31_s19, %s575_s20  ;;  %p581_p2 = scmp.lt.s32.totalorder %s575_s20, %s575_s20 }
   0x7   :  { %p582_p3 = por %p581_p2, %p580_p1 }
   0x9   :  { %p583_p4 = pnand %p582_p3, %p576_p0 }
   0xb   :  { %586 = shalt.err (!%p583_p4)
}
   0xc   :  { %s654_s21 = smov 64   ;;  %s655_s22 = smov 4  }
   0xd   :  { %36 = dma.hbm_to_vmem [thread:$0]  %s718_s1, 2048, %s31_s19, [#allocation7], %s654_s21, %s654_s21, %s655_s22  }
   0xe   :  { %s656_s25 = smov [#allocation3]  }
   0xf   :  { %s18_s26 = sshll.u32 %s656_s25, 4  ;;  %s19_s26 = int_to_ptr.vmem [resolvable:$true] %s18_s26 }
  0x10   :  { %s595_s27 = scalar_lea.vmem %s19_s26, 256  ;;  %p600_p6 = scmp.lt.s32.totalorder %s19_s26, %s19_s26 }
  0x11   :  { %p596_p5 = scmp.ne.s32.totalorder %s19_s26, %s595_s27  ;;  %p601_p7 = scmp.lt.s32.totalorder %s595_s27, %s595_s27 }
  0x13   :  { %p602_p8 = por %p601_p7, %p600_p6 }
  0x15   :  { %p603_p9 = pnand %p602_p8, %p596_p5 }
  0x17   :  { %606 = shalt.err (!%p603_p9)
}
  0x18   :  { %s657_s28 = smov 128   ;;  %s658_s29 = smov 8  }
  0x19   :  { %24 = dma.hbm_to_vmem [thread:$0]  %s717_s0, 256, %s19_s26, [#allocation4], %s657_s28, %s657_s28, %s658_s29  }
  0x1a   :  { %s659_s1 = smov [#allocation8]  }
  0x1b   :  { %s44_s7 = sshll.u32 %s659_s1, 4  ;;  %s45_s7 = int_to_ptr.vmem [resolvable:$true] %s44_s7 }
  0x1c   :  { %s615_s8 = scalar_lea.vmem %s45_s7, 1024  ;;  %p620_p11 = scmp.lt.s32.totalorder %s45_s7, %s45_s7 }
  0x1d   :  { %p616_p10 = scmp.ne.s32.totalorder %s45_s7, %s615_s8  ;;  %p621_p12 = scmp.lt.s32.totalorder %s615_s8, %s615_s8 }
  0x1f   :  { %p622_p13 = por %p621_p12, %p620_p11 }
  0x21   :  { %p623_p0 = pnand %p622_p13, %p616_p10 }
  0x23   :  { %626 = shalt.err (!%p623_p0)
}
  0x24   :  { %50 = dma.hbm_to_vmem [thread:$0]  %s720_s3, 1024, %s45_s7, [#allocation7], %s654_s21, %s654_s21, %s655_s22  }
  0x25   :  { %647 = dma.done.wait [#allocation4], 256  }
  0x26   :  { %648 = vsyncadd [#allocation4], 4294967040 }
  0x27   :  { %649 = dma.done.wait [#allocation7], 3072  }
  0x28   :  { %650 = vsyncadd [#allocation7], 4294964224  ;;  %v660_v0 = vmov 0.0   ;;  %v531_v1 = vld [vmem:[#allocation6 + $0x78] sm:$0xff]   ;;  %v533_v3 = vld [vmem:[#allocation6 + $0x70] sm:$0xff]   ;;  %vm661_vm0 = vmmov 0  }
  0x29   :  { %501 = vmatprep.subr.bf16.mxu1 %v660_v0  ;;  %v532_v2 = vld [vmem:[#allocation6 + $0x38] sm:$0xff]   ;;  %470 = vmatprep.subr.bf16.mxu0 %v531_v1  ;;  %v534_v4 = vld [vmem:[#allocation6 + $0x30] sm:$0xff]   ;;  %v535_v5 = vld [vmem:[#allocation6 + $0x68] sm:$0xff]  }
  0x2a   :  { %471 = vmatpush3.bf16.msra.mxu0 %v532_v2  ;;  %v536_v6 = vld [vmem:[#allocation6 + $0x28] sm:$0xff]   ;;  %v537_v7 = vld [vmem:[#allocation6 + $0x60] sm:$0xff]   ;;  %v539_v9 = vld [vmem:[#allocation6 + $0x58] sm:$0xff]   ;;  %517 = vmatprep.mubr.msk.bf16.mxu1 %vm661_vm0, %v660_v0 }
  0x2b   :  { %472 = vmatprep.subr.bf16.mxu0 %v533_v3  ;;  %v538_v8 = vld [vmem:[#allocation6 + $0x20] sm:$0xff]   ;;  %v540_v10 = vld [vmem:[#allocation6 + $0x18] sm:$0xff]   ;;  %v541_v11 = vld [vmem:[#allocation6 + $0x50] sm:$0xff]  }
  0x2c   :  { %v542_v12 = vld [vmem:[#allocation6 + $0x10] sm:$0xff]   ;;  %v543_v14 = vld [vmem:[#allocation6 + $0x48] sm:$0xff]   ;;  %v550_v15 = vld [vmem:[#allocation8 + $0x38] sm:$0xff]  }
  0x2d   :  { %v549_v13 = vld [vmem:[#allocation3 + $0x4] ss:$8 sps:$4 sm:$0xff]   ;;  %502 = vmatpush3.bf16.msra.mxu1 %v550_v15  ;;  %v544_v17 = vld [vmem:[#allocation6 + $0x8] sm:$0xff]   ;;  %v545_v18 = vld [vmem:[#allocation6 + $0x40] sm:$0xff]  }
  0x2e   :  { %473 = vmatpush3.bf16.msra.mxu0 %v534_v4  ;;  %246 = vmatprep.mubr.bf16.mxu0 %v549_v13  ;;  %v551_v16 = vld [vmem:[#allocation8 + $0x30] sm:$0xff]   ;;  %v546_v19 = vld [vmem:[#allocation6] sm:$0xff]   ;;  %v552_v21 = vld [vmem:[#allocation8 + $0x28] sm:$0xff]  }
  0x2f   :  { %474 = vmatprep.subr.bf16.mxu0 %v535_v5  ;;  %503 = vmatprep.subr.bf16.mxu1 %v660_v0  ;;  %v547_v20 = vld [vmem:[#allocation3] ss:$8 sps:$4 sm:$0xff]   ;;  %v553_v22 = vld [vmem:[#allocation8 + $0x20] sm:$0xff]   ;;  %v556_v25 = vld [vmem:[#allocation8 + $0x8] sm:$0xff]  }
  0x30   :  { %v554_v23 = vld [vmem:[#allocation8 + $0x18] sm:$0xff]   ;;  %v555_v24 = vld [vmem:[#allocation8 + $0x10] sm:$0xff]   ;;  %v557_v26 = vld [vmem:[#allocation8] sm:$0xff]  }
  0x31   :  { %504 = vmatpush3.bf16.msra.mxu1 %v551_v16  ;;  %v432_v30 = vld [vmem:[%s719_s2] ss:$0 sm:$0xff]  ;;  %s662_s2 = smov [#allocation9]  }
  0x32   :  { %475 = vmatpush3.bf16.msra.mxu0 %v536_v6  ;;  %505 = vmatprep.subr.bf16.mxu1 %v660_v0  ;;  %v453_v40 = vld [vmem:[%s721_s4] ss:$0 sm:$0xff]  ;;  %s419_s4 = sshll.u32 %s662_s2, 4  ;;  %s420_s4 = int_to_ptr.vmem [resolvable:$true] %s419_s4 }
  0x33   :  { %476 = vmatprep.subr.bf16.mxu0 %v537_v7  ;;  %s627_s13 = scalar_lea.vmem %s420_s4, 256  ;;  %p632_p2 = scmp.lt.s32.totalorder %s420_s4, %s420_s4 }
  0x34   :  { %p628_p1 = scmp.ne.s32.totalorder %s420_s4, %s627_s13  ;;  %p633_p3 = scmp.lt.s32.totalorder %s627_s13, %s627_s13 }
  0x35   :  { %506 = vmatpush3.bf16.msra.mxu1 %v552_v21 }
  0x36   :  { %477 = vmatpush3.bf16.msra.mxu0 %v538_v8  ;;  %507 = vmatprep.subr.bf16.mxu1 %v660_v0  ;;  %p634_p4 = por %p633_p3, %p632_p2 }
  0x37   :  { %478 = vmatprep.subr.bf16.mxu0 %v539_v9 }
  0x38   :  { %p635_p5 = pnand %p634_p4, %p628_p1 }
  0x39   :  { %508 = vmatpush3.bf16.msra.mxu1 %v553_v22 }
  0x3a   :  { %479 = vmatpush3.bf16.msra.mxu0 %v540_v10  ;;  %509 = vmatprep.subr.bf16.mxu1 %v660_v0 }
  0x3b   :  { %480 = vmatprep.subr.bf16.mxu0 %v541_v11 }
  0x3d   :  { %510 = vmatpush3.bf16.msra.mxu1 %v554_v23 }
  0x3e   :  { %481 = vmatpush3.bf16.msra.mxu0 %v542_v12  ;;  %511 = vmatprep.subr.bf16.mxu1 %v660_v0 }
  0x3f   :  { %482 = vmatprep.subr.bf16.mxu0 %v543_v14 }
  0x41   :  { %512 = vmatpush3.bf16.msra.mxu1 %v555_v24 }
  0x42   :  { %483 = vmatpush3.bf16.msra.mxu0 %v544_v17  ;;  %513 = vmatprep.subr.bf16.mxu1 %v660_v0 }
  0x43   :  { %484 = vmatprep.subr.bf16.mxu0 %v545_v18 }
  0x45   :  { %514 = vmatpush3.bf16.msra.mxu1 %v556_v25 }
  0x46   :  { %485 = vmatpush3.bf16.msra.mxu0 %v546_v19  ;;  %515 = vmatprep.subr.bf16.mxu1 %v660_v0 }
  0x49   :  { %247 = vmatmul.mubr.bf16.vlgmr.msra.gmra.mxu0 %v547_v20  ;;  %516 = vmatpush3.bf16.msra.mxu1 %v557_v26 }
 0x109   :  { %v486_v27 = vpop.f32.mrf.mxu0 }
 0x10b   :  { %v487_v28 = vpop.f32.mrf.mxu0 }
 0x10c   :  { %v488_v29 = vadd.f32 %v487_v28, %v486_v27 }
 0x10d   :  { %v489_v31 = vpop.f32.mrf.mxu0 }
 0x10e   :  { %v249_v33 = vadd.f32 %v488_v29, %v432_v30 }
 0x10f   :  { %v490_v32 = vpop.f32.mrf.mxu0 }
 0x110   :  { %v491_v34 = vadd.f32 %v490_v32, %v489_v31  ;;  %v255_v36 = vmax.f32 %v249_v33, 0.0 }
 0x112   :  { %v252_v35 = vadd.f32 %v491_v34, %v432_v30 }
 0x114   :  { %v256_v37 = vmax.f32 %v252_v35, 0.0 }
 0x116   :  { %v468_v38 = vpack.c.bf16 %v256_v37, %v255_v36 }
 0x118   :  { %469 = vst [vmem:[#allocation2] sm:$0xff] %v468_v38  }
 0x11f   :  { %v558_v39 = vld [vmem:[#allocation2] sm:$0xff]  }
 0x120   :  { %518 = vmatmul.mubr.bf16.vlgmr.msra.gmra.mxu1 %v558_v39 }
 0x1e0   :  { %v380_v41 = vpop.f32.mrf.mxu1 }
 0x1e1   :  { %v381_v42 = vadd.f32 %v453_v40, %v380_v41 }
 0x1e2   :  { %v519_v43 = vpop.f32.mrf.mxu1 }
 0x1e3   :  { %394 = vmax.xlane.f32.xlu0 %v381_v42 }
 0x1e4   :  { %v383_v44 = vpop.f32.mrf.mxu1 }
 0x1e5   :  { %v384_v45 = vadd.f32 %v453_v40, %v383_v44 }
 0x1e6   :  { %v520_v46 = vpop.f32.mrf.mxu1 }
 0x1e7   :  { %396 = vmax.xlane.f32.xlu0 %v384_v45 }
 0x26c   :  { %v395_v47 = vpop.xlane.xlu0 %394 }
 0x26d   :  { %v398_v48 = vsub.f32 %v381_v42, %v395_v47 }
 0x26f   :  { %v400_v49 = vmul.f32 1.442695, %v398_v48 }
 0x270   :  { %v397_v50 = vpop.xlane.xlu0 %396 }
 0x271   :  { %559 = vpow2.f32 %v400_v49  ;;  %v399_v51 = vsub.f32 %v384_v45, %v397_v50 }
 0x273   :  { %v402_v52 = vmul.f32 1.442695, %v399_v51 }
 0x275   :  { %561 = vpow2.f32 %v402_v52 }
 0x27e   :  { %v560_v53 = vpop.eup %559 }
 0x27f   :  { %404 = vadd.xlane.f32.xlu1 %v560_v53 }
 0x282   :  { %v562_v54 = vpop.eup %561 }
 0x283   :  { %406 = vadd.xlane.f32.xlu1 %v562_v54 }
 0x308   :  { %v405_v55 = vpop.xlane.xlu1 %404 }
 0x309   :  { %563 = vrcp.f32 %v405_v55 }
 0x30c   :  { %v407_v56 = vpop.xlane.xlu1 %406 }
 0x30d   :  { %565 = vrcp.f32 %v407_v56 }
 0x316   :  { %v564_v57 = vpop.eup %563 }
 0x317   :  { %v409_v58 = vmul.f32 %v564_v57, %v560_v53 }
 0x319   :  { %412 = vst [vmem:[#allocation9] sm:$0xff] %v409_v58 }
 0x31a   :  { %v566_v59 = vpop.eup %565 }
 0x31b   :  { %v411_v60 = vmul.f32 %v566_v59, %v562_v54 }
 0x31d   :  { %413 = vst [vmem:[#allocation9 + $0x8] sm:$0xff] %v411_v60 }
 0x31e   :  { %638 = shalt.err (!%p635_p5)
}
 0x31f   :  { %425 = dma.vmem_to_hbm [thread:$0]  %s420_s4, 256, %s722_s5, [#allocation5], %s657_s28, %s657_s28, %s658_s29  }
 0x320   :  { %651 = dma.done.wait [#allocation5], 256  }
 0x321   :  { %652 = vsyncadd [#allocation5], 4294967040 }
 0x322   :  { %429 = vsyncpa [#allocation4], 1 }
 0x323   :  { %430 = vsyncpa [#allocation7], 1 }
 0x324   :  { %431 = vsyncpa [#allocation5], 1 }

</bundles_post_ra>
